<compile_context>
chip_gen: v7x
topology: tpu7x:2x2x1
jax: 0.10.0
libtpu: 0.0.40
codegen_flags: <defaults>
</compile_context>

<pallas_src>
import math
import functools

import jax
import jax.numpy as jnp
from jax.experimental import pallas as pl
from jax.experimental.pallas import tpu as pltpu


# ------------------------------------------------------------------- VMEM budget
def _vmem_budget():
    """Generation-aware scoped-VMEM budget: ~3/4 of physical VMEM, capped at 96 MiB
    (=> 96 MiB on v5e/v6e with 128 MiB, 48 MiB on v7x with 64 MiB)."""
    cap = 128 * 1024 * 1024
    try:
        cap = int(getattr(pltpu.get_tpu_info(), "vmem_capacity_bytes", cap))
    except Exception:
        pass
    return min((cap * 3) // 4, 96 * 1024 * 1024)


# --------------------------------------------------------------------------- config
class Config:
    def __init__(self, n_embd, n_head, n_query_groups, head_size, block_size,
                 rotary_percentage=1.0, bias=True):
        self.n_embd = n_embd
        self.n_head = n_head
        self.n_query_groups = n_query_groups
        self.head_size = head_size
        self.block_size = block_size
        self.rotary_percentage = rotary_percentage
        self.rope_n_elem = int(rotary_percentage * head_size)
        self.bias = bias


# ----------------------------------------------------------------------- tiling util
def _fit_tile(dim, target, align):
    """Largest tile <= target that divides dim and is a multiple of `align`
    (sublane 8 / lane 128).  Full dim (always legal) when dim is small or when no
    aligned divisor exists."""
    if dim <= target:
        return dim
    for cand in range(min(target, dim), 0, -1):
        if dim % cand == 0 and cand % align == 0:
            return cand
    # TODO(synk): masked tail (pl.cdiv grid) instead of a single full-dim block.
    return dim


# ------------------------------------------------------------------ Pallas: linear
def _linear_kernel(x_ref, w_ref, b_ref, o_ref, acc_ref):
    # x: (tm, tk) bf16, w: (tk, tn) bf16, b: (1, tn) f32 -> o: (tm, tn)
    @pl.when(pl.program_id(2) == 0)
    def _():
        acc_ref[...] = jnp.zeros_like(acc_ref)

    acc_ref[...] += jnp.dot(x_ref[...], w_ref[...],
                            preferred_element_type=jnp.float32)

    @pl.when(pl.program_id(2) == pl.num_programs(2) - 1)
    def _():
        o_ref[...] = (acc_ref[...] + b_ref[...]).astype(o_ref.dtype)


def linear(x, w, b, *, tm=512, tn=512, tk=2048, out_dtype=None):
    """y = x @ w + b.  `w` is stored (K, N), i.e. the transposed nn.Linear weight, so
    the MXU consumes the RHS tile directly (contracting dim 0, no in-kernel transpose).
    Operands are fed to the MXU in bf16 with f32 accumulation."""
    M, K = x.shape
    Kw, N = w.shape
    assert K == Kw
    out_dtype = x.dtype if out_dtype is None else out_dtype

    tm = _fit_tile(M, tm, 8)       # sublane axis
    tn = _fit_tile(N, tn, 128)     # lane axis
    tk = _fit_tile(K, tk, 128)     # lane axis (full K preferred for typical n_embd)
    grid = (M // tm, N // tn, K // tk)

    return pl.pallas_call(
        _linear_kernel,
        out_shape=jax.ShapeDtypeStruct((M, N), out_dtype),
        grid=grid,
        in_specs=[
            pl.BlockSpec((tm, tk), lambda i, j, k: (i, k)),
            pl.BlockSpec((tk, tn), lambda i, j, k: (k, j)),
            pl.BlockSpec((1, tn), lambda i, j, k: (0, j)),
        ],
        out_specs=pl.BlockSpec((tm, tn), lambda i, j, k: (i, j)),
        scratch_shapes=[pltpu.VMEM((tm, tn), jnp.float32)],
        compiler_params=pltpu.CompilerParams(
            dimension_semantics=("parallel", "parallel", "arbitrary"),
            vmem_limit_bytes=_vmem_budget()),
    )(x.astype(jnp.bfloat16), w.astype(jnp.bfloat16),
      b.reshape(1, N).astype(jnp.float32))


# --------------------------------------------------------------- Pallas: attention
def _attn_kernel(q_ref, k_ref, v_ref, o_ref, s_ref, m_ref, l_ref, acc_ref, *, scale):
    # Blocks per grid cell (b, qi, kj):
    #   q:   (1, n_head, tq, hs)            bf16 (resident across kj)
    #   k,v: (1, n_query_groups, tkv, hs)   bf16 (streamed over kj)
    #   o:   (1, tq, n_head*hs)             lane-dense y slab (resident across kj)
    #   s:   (1, n_head, tq, tkv)           f32 masked/scaled scores tile
    # scratch (persist across kj): m, l (ng, q_per_kv*tq, 1); acc (ng, q_per_kv*tq, hs)
    nh = q_ref.shape[1]
    tq = q_ref.shape[2]
    hs = q_ref.shape[3]
    ng = k_ref.shape[1]
    tkv = k_ref.shape[2]
    q_per_kv = nh // ng
    rows = q_per_kv * tq

    qi = pl.program_id(1)
    kj = pl.program_id(2)
    last_kv = pl.num_programs(2) - 1

    neg = jnp.float32(-1e30)   # finite: exp underflows to exactly 0, no NaN hazard

    @pl.when(kj == 0)
    def _init():
        m_ref[...] = jnp.full_like(m_ref, -jnp.inf)
        l_ref[...] = jnp.zeros_like(l_ref)
        acc_ref[...] = jnp.zeros_like(acc_ref)

    # Causal block-level skip: kv tile is fully above the diagonal iff its first
    # column is past the last query row of this q block.
    needed = kj * tkv < (qi + 1) * tq

    @pl.when(needed)
    def _compute():
        # Element-level causal mask for this (qi, kj) tile (shared by all groups).
        qrow = (jax.lax.broadcasted_iota(jnp.int32, (q_per_kv, tq, tkv), 1)
                .reshape(rows, tkv) + qi * tq)
        kcol = jax.lax.broadcasted_iota(jnp.int32, (rows, tkv), 1) + kj * tkv
        causal = kcol <= qrow

        for g in range(ng):                         # ng is a compile-time constant
            # Stack the group's q_per_kv heads along M: one MXU sequence per group.
            q_g = q_ref[0, g * q_per_kv:(g + 1) * q_per_kv].reshape(rows, hs)  # bf16
            k_g = k_ref[0, g]                                                  # bf16
            v_g = v_ref[0, g]                                                  # bf16

            # q @ k^T without materializing a transpose (contract last dims).
            s = jax.lax.dot_general(
                q_g, k_g, dimension_numbers=(((1,), (1,)), ((), ())),
                preferred_element_type=jnp.float32) * scale                    # f32
            s = jnp.where(causal, s, neg)
            s_ref[0, g * q_per_kv:(g + 1) * q_per_kv] = s.reshape(q_per_kv, tq, tkv)

            # Online softmax update (all f32 VPU/EUP math — v5e-safe).
            m_prev = m_ref[g]
            m_new = jnp.maximum(m_prev, jnp.max(s, axis=-1, keepdims=True))
            alpha = jnp.exp(m_prev - m_new)
            p = jnp.exp(s - m_new)
            l_ref[g] = alpha * l_ref[g] + jnp.sum(p, axis=-1, keepdims=True)
            acc_ref[g] = alpha * acc_ref[g] + jax.lax.dot_general(
                p.astype(v_g.dtype), v_g,                 # bf16 operands, f32 acc
                dimension_numbers=(((1,), (0,)), ((), ())),
                preferred_element_type=jnp.float32)
            m_ref[g] = m_new

    @pl.when(jnp.logical_not(needed))
    def _masked_tile():
        # Fully-masked kv tile: no MXU / softmax work, just fill the scores tile.
        s_ref[0] = jnp.full(s_ref.shape[1:], neg, dtype=s_ref.dtype)

    @pl.when(kj == last_kv)
    def _finalize():
        for g in range(ng):
            # Exact normalization (y must match att @ v of the reference softmax).
            y_g = acc_ref[g] / l_ref[g]                       # (q_per_kv*tq, hs) f32
            for hq in range(q_per_kv):
                h = g * q_per_kv + hq
                # TODO(synk): for hs < 128 pack the whole group's heads into one
                # (tq, q_per_kv*hs) slab before storing to avoid masked half-vreg vst.
                o_ref[0, :, h * hs:(h + 1) * hs] = (
                    y_g[hq * tq:(hq + 1) * tq].astype(o_ref.dtype))


def attention(q, k, v, head_size):
    """q: (B, n_head, T, hs); k, v: (B, n_query_groups, T, hs), all bf16.
    Returns y: (B, T, n_head*hs) bf16 and scores: (B, n_head, T, T) f32 (masked,
    scaled logits — the exact softmax for the statistics is taken in XLA)."""
    B, nh, T, hs = q.shape
    ng = k.shape[1]
    q_per_kv = nh // ng
    scale = 1.0 / math.sqrt(head_size)

    if T % 128 == 0:
        tq = tkv = 128
    else:
        tq = tkv = T           # full dim is always a legal block
    n_q, n_kv = T // tq, T // tkv

    kernel = functools.partial(_attn_kernel, scale=scale)
    y, scores = pl.pallas_call(
        kernel,
        out_shape=(jax.ShapeDtypeStruct((B, T, nh * hs), q.dtype),
                   jax.ShapeDtypeStruct((B, nh, T, T), jnp.float32)),
        grid=(B, n_q, n_kv),
        in_specs=[
            pl.BlockSpec((1, nh, tq, hs), lambda b, qi, kj: (b, 0, qi, 0)),
            pl.BlockSpec((1, ng, tkv, hs), lambda b, qi, kj: (b, 0, kj, 0)),
            pl.BlockSpec((1, ng, tkv, hs), lambda b, qi, kj: (b, 0, kj, 0)),
        ],
        out_specs=(
            pl.BlockSpec((1, tq, nh * hs), lambda b, qi, kj: (b, qi, 0)),
            pl.BlockSpec((1, nh, tq, tkv), lambda b, qi, kj: (b, 0, qi, kj)),
        ),
        scratch_shapes=[
            pltpu.VMEM((ng, q_per_kv * tq, 1), jnp.float32),   # m
            pltpu.VMEM((ng, q_per_kv * tq, 1), jnp.float32),   # l
            pltpu.VMEM((ng, q_per_kv * tq, hs), jnp.float32),  # acc
        ],
        compiler_params=pltpu.CompilerParams(
            # KV axis is the reduction (scratch carry) -> "arbitrary".
            dimension_semantics=("parallel", "parallel", "arbitrary"),
            vmem_limit_bytes=_vmem_budget()),
    )(q, k, v)
    return y, scores


# ------------------------------------------------------------------------ RoPE glue
def apply_rope(x, cos, sin):
    head_size = x.shape[-1]
    x1 = x[..., :head_size // 2]
    x2 = x[..., head_size // 2:]
    rotated = jnp.concatenate((-x2, x1), axis=-1)
    return (x * cos + rotated * sin).astype(x.dtype)


# ------------------------------------------------------------------- forward (glue)
def causal_self_attention_forward(params, config, x, cos, sin, sorted_att_buffer):
    B, T, C = x.shape
    in_dtype = x.dtype

    qkv = linear(x.reshape(B * T, C), params["attn_w"], params["attn_b"],
                 out_dtype=in_dtype)
    qkv = qkv.reshape(B, T, -1)

    q_per_kv = config.n_head // config.n_query_groups
    total_qkv = q_per_kv + 2
    qkv = qkv.reshape(B, T, config.n_query_groups, total_qkv, config.head_size)
    qkv = jnp.transpose(qkv, (0, 2, 3, 1, 4))      # (B, ng, total_qkv, T, hs)

    q = qkv[:, :, :q_per_kv].reshape(B, config.n_head, T, config.head_size)
    # K/V kept at (B, n_query_groups, T, hs) — GQA groups are resolved in-kernel,
    # no duplicated KV in HBM/DMA.
    k = qkv[:, :, q_per_kv]                        # (B, ng, T, hs)
    v = qkv[:, :, q_per_kv + 1]                    # (B, ng, T, hs)

    rne = config.rope_n_elem
    q = jnp.concatenate((apply_rope(q[..., :rne], cos, sin), q[..., rne:]), axis=-1)
    k = jnp.concatenate((apply_rope(k[..., :rne], cos, sin), k[..., rne:]), axis=-1)

    # bf16 MXU operands (f32 accumulation and f32 softmax math in-kernel).
    y, scores = attention(q.astype(jnp.bfloat16), k.astype(jnp.bfloat16),
                          v.astype(jnp.bfloat16), config.head_size)

    # Attention-statistics side effect (matches: softmax -> sort desc -> mean(B, nh)).
    # Sort has no Pallas TPU lowering; exact f32 softmax of the kernel's masked scores
    # keeps the buffer consistent with the PyTorch reference.
    # Note: assumes T == config.block_size (same implicit assumption as the reference).
    att = jax.nn.softmax(scores, axis=-1)
    sorted_att = jnp.flip(jnp.sort(att, axis=-1), axis=-1).mean(axis=(0, 1))
    new_sorted_att_buffer = sorted_att_buffer + sorted_att

    out = linear(y.reshape(B * T, config.n_embd), params["proj_w"], params["proj_b"],
                 out_dtype=in_dtype)
    return out.reshape(B, T, config.n_embd), new_sorted_att_buffer


# ---------------------------------------------------------------------------- main
def init_params(key, config):
    shape_out = (config.n_head + 2 * config.n_query_groups) * config.head_size
    k1, k2, k3, k4 = jax.random.split(key, 4)

    def lin_init(kw, kb, fan_in, fan_out):
        bound = 1.0 / math.sqrt(fan_in)
        # Weights stored (in, out) == transposed nn.Linear layout so the matmul kernel
        # consumes a (K, N) RHS tile directly on the MXU (no per-tile transpose).
        w = jax.random.uniform(kw, (fan_in, fan_out), jnp.float32, -bound, bound)
        b = jax.random.uniform(kb, (fan_out,), jnp.float32, -bound, bound)
        return w, b

    attn_w, attn_b = lin_init(k1, k2, config.n_embd, shape_out)
    proj_w, proj_b = lin_init(k3, k4, config.n_embd, config.n_embd)
    return {"attn_w": attn_w, "attn_b": attn_b, "proj_w": proj_w, "proj_b": proj_b}


if __name__ == "__main__":
    cfg = Config(n_embd=32, n_head=4, n_query_groups=2, head_size=8,
                 block_size=8, rotary_percentage=0.5, bias=True)

    B, T = 2, cfg.block_size
    key = jax.random.PRNGKey(0)
    kx, kp = jax.random.split(key)

    x = jax.random.normal(kx, (B, T, cfg.n_embd), jnp.float32)

    # RoPE cache (cos/sin), shape (T, rope_n_elem)
    theta = 10000.0 ** (-jnp.arange(0, cfg.rope_n_elem, dtype=jnp.float32)
                        / cfg.rope_n_elem)
    pos = jnp.arange(T, dtype=jnp.float32)[:, None]
    cos = jnp.cos(pos * theta[None, :])
    sin = jnp.sin(pos * theta[None, :])

    params = init_params(kp, cfg)
    sorted_att_buffer = jnp.zeros((cfg.block_size, cfg.block_size), jnp.float32)

    out, new_buf = causal_self_attention_forward(params, cfg, x, cos, sin,
                                                 sorted_att_buffer)
    out = jax.block_until_ready(out)
    new_buf = jax.block_until_ready(new_buf)

    assert out.shape == (B, T, cfg.n_embd)
    assert new_buf.shape == (cfg.block_size, cfg.block_size)
    assert bool(jnp.all(jnp.isfinite(out)))
    assert bool(jnp.all(jnp.isfinite(new_buf)))
    # softmax rows (incl. the causal zeros) should sum to ~T per accumulation step
    assert abs(float(new_buf.sum()) - T) < 1e-3
    print("KERNEL_OK")
</pallas_src>

<mosaic_0001>
module attributes {stable_mosaic.version = 11 : i64} {
  func.func @_linear_kernel(%arg0: i32, %arg1: i32, %arg2: i32, %arg3: memref<16x32xbf16, #tpu.memory_space<vmem>>, %arg4: memref<32x64xbf16, #tpu.memory_space<vmem>>, %arg5: memref<1x64xf32, #tpu.memory_space<vmem>>, %arg6: memref<16x64xf32, #tpu.memory_space<vmem>>, %arg7: memref<16x64xf32, #tpu.memory_space<vmem>>) attributes {dimension_semantics = [#tpu.dimension_semantics<parallel>, #tpu.dimension_semantics<parallel>, #tpu.dimension_semantics<arbitrary>], iteration_bounds = array<i64: 1, 1, 1>, scalar_prefetch = 0 : i64, scratch_operands = 1 : i64, tpu.core_type = #tpu.core_type<tc>, window_params = [{transform_indices = @transform_0, window_bounds = array<i64: 16, 32>}, {transform_indices = @transform_1, window_bounds = array<i64: 32, 64>}, {transform_indices = @transform_2, window_bounds = array<i64: 1, 64>}, {transform_indices = @transform_3, window_bounds = array<i64: 16, 64>}]} {
    %c0_i32 = arith.constant 0 : i32
    %0 = arith.cmpi eq, %arg2, %c0_i32 : i32
    %1 = arith.extui %0 : i1 to i32
    %c0_i32_0 = arith.constant 0 : i32
    %2 = arith.cmpi ne, %1, %c0_i32_0 : i32
    scf.if %2 {
      %cst_10 = arith.constant 0.000000e+00 : f32
      %12 = vector.broadcast %cst_10 : f32 to vector<16x64xf32>
      %c0_11 = arith.constant 0 : index
      %c0_12 = arith.constant 0 : index
      %13 = vector.load %arg7[%c0_11, %c0_12] : memref<16x64xf32, #tpu.memory_space<vmem>>, vector<16x64xf32>
      tpu.vector_store %arg7[%c0_11, %c0_12], %12 {strides = array<i32>} : memref<16x64xf32, #tpu.memory_space<vmem>>, vector<16x64xf32>,
    } else {
    }
    %c0 = arith.constant 0 : index
    %c0_1 = arith.constant 0 : index
    %3 = vector.load %arg7[%c0, %c0_1] : memref<16x64xf32, #tpu.memory_space<vmem>>, vector<16x64xf32>
    %c0_2 = arith.constant 0 : index
    %c0_3 = arith.constant 0 : index
    %4 = vector.load %arg3[%c0_2, %c0_3] : memref<16x32xbf16, #tpu.memory_space<vmem>>, vector<16x32xbf16>
    %c0_4 = arith.constant 0 : index
    %c0_5 = arith.constant 0 : index
    %5 = vector.load %arg4[%c0_4, %c0_5] : memref<32x64xbf16, #tpu.memory_space<vmem>>, vector<32x64xbf16>
    %cst = arith.constant dense<0.000000e+00> : vector<16x64xf32>
    %6 = tpu.matmul %4, %5, %cst {dimension_numbers = #tpu.dot_dimension_numbers<[1], [0], [0], [1], [0, 0, 1, 1], [], []>} : vector<16x32xbf16>, vector<32x64xbf16>, vector<16x64xf32> -> vector<16x64xf32>
    %7 = arith.addf %3, %6 : vector<16x64xf32>
    %c0_6 = arith.constant 0 : index
    %c0_7 = arith.constant 0 : index
    %8 = vector.load %arg7[%c0_6, %c0_7] : memref<16x64xf32, #tpu.memory_space<vmem>>, vector<16x64xf32>
    tpu.vector_store %arg7[%c0_6, %c0_7], %7 {strides = array<i32>} : memref<16x64xf32, #tpu.memory_space<vmem>>, vector<16x64xf32>,
    %c0_i32_8 = arith.constant 0 : i32
    %9 = arith.cmpi eq, %arg2, %c0_i32_8 : i32
    %10 = arith.extui %9 : i1 to i32
    %c0_i32_9 = arith.constant 0 : i32
    %11 = arith.cmpi ne, %10, %c0_i32_9 : i32
    scf.if %11 {
      %c0_10 = arith.constant 0 : index
      %c0_11 = arith.constant 0 : index
      %12 = vector.load %arg7[%c0_10, %c0_11] : memref<16x64xf32, #tpu.memory_space<vmem>>, vector<16x64xf32>
      %c0_12 = arith.constant 0 : index
      %c0_13 = arith.constant 0 : index
      %13 = vector.load %arg5[%c0_12, %c0_13] : memref<1x64xf32, #tpu.memory_space<vmem>>, vector<1x64xf32>
      %14 = vector.broadcast %13 : vector<1x64xf32> to vector<16x64xf32>
      %15 = arith.addf %12, %14 : vector<16x64xf32>
      %c0_14 = arith.constant 0 : index
      %c0_15 = arith.constant 0 : index
      %16 = vector.load %arg6[%c0_14, %c0_15] : memref<16x64xf32, #tpu.memory_space<vmem>>, vector<16x64xf32>
      tpu.vector_store %arg6[%c0_14, %c0_15], %15 {strides = array<i32>} : memref<16x64xf32, #tpu.memory_space<vmem>>, vector<16x64xf32>,
    } else {
    }
    return
  }
  func.func @transform_0(%arg0: i32, %arg1: i32, %arg2: i32) -> (i32, i32) {
    %c0_i32 = arith.constant 0 : i32
    return %arg0, %arg2 : i32, i32
  }
  func.func @transform_1(%arg0: i32, %arg1: i32, %arg2: i32) -> (i32, i32) {
    %c0_i32 = arith.constant 0 : i32
    return %arg2, %arg1 : i32, i32
  }
  func.func @transform_2(%arg0: i32, %arg1: i32, %arg2: i32) -> (i32, i32) {
    %c0_i32 = arith.constant 0 : i32
    %c0_i32_0 = arith.constant 0 : i32
    return %c0_i32, %arg1 : i32, i32
  }
  func.func @transform_3(%arg0: i32, %arg1: i32, %arg2: i32) -> (i32, i32) {
    %c0_i32 = arith.constant 0 : i32
    return %arg0, %arg1 : i32, i32
  }
}

</mosaic_0001>

<bundles_post_ra>
// kernel: tpu_custom_call.1
= control target key start
LH: loop header
LB: loop body
LE: loop exit
PB: predicated region body
PF: predicated region fallthrough
CT: control target
= control target key end

     0   :  { %8 = vsyncpa [#allocation4], 0  ;;  %s385_s0 = inlined_call_operand.hbm [shape: bf16[16,32], index: 0, kind: input, shape index: {}]   ;;  %s386_s1 = inlined_call_operand.hbm [shape: bf16[32,64], index: 1, kind: input, shape index: {}]   ;;  %s387_s2 = inlined_call_operand.hbm [shape: f32[1,64], index: 2, kind: input, shape index: {}]   ;;  %s388_s3 = inlined_call_operand.hbm [shape: f32[16,64], index: 3, kind: output, shape index: {}]  }
   0x1   :  { %9 = vsyncpa [#allocation7], 0 }
   0x2   :  { %10 = vsyncpa [#allocation5], 0  ;;  %s294_s12 = smov [#allocation6]   ;;  %s295_s14 = smov [#allocation3]  }
   0x3   :  { %s28_s13 = sshll.u32 %s294_s12, 4  ;;  %s16_s15 = sshll.u32 %s295_s14, 4  ;;  %s29_s13 = int_to_ptr.vmem [resolvable:$true] %s28_s13  ;;  %s324_s15 = int_to_ptr.vmem [resolvable:$true] %s16_s15 }
   0x4   :  { %s200_s18 = scalar_lea.hbm %s386_s1, 256 }
   0x5   :  { %p201_p0 = scmp.ne.s32.totalorder %s386_s1, %s200_s18  ;;  %p204_p1 = scmp.lt.u32.totalorder %s200_s18, %s386_s1 }
   0x7   :  { %p206_p2 = pnand %p204_p1, %p201_p0 }
   0x9   :  { %209 = shalt.err (!%p206_p2)
}
   0xa   :  { %s210_s23 = scalar_lea.vmem %s29_s13, 256  ;;  %p215_p4 = scmp.lt.s32.totalorder %s29_s13, %s29_s13 }
   0xb   :  { %p211_p3 = scmp.ne.s32.totalorder %s29_s13, %s210_s23  ;;  %p216_p5 = scmp.lt.s32.totalorder %s210_s23, %s210_s23 }
   0xd   :  { %p217_p6 = por %p216_p5, %p215_p4 }
   0xf   :  { %p218_p7 = pnand %p217_p6, %p211_p3 }
  0x11   :  { %221 = shalt.err (!%p218_p7)
}
  0x12   :  { %s296_s24 = smov 64   ;;  %s297_s25 = smov 4  }
  0x13   :  { %34 = dma.hbm_to_vmem [thread:$0]  %s386_s1, 256, %s29_s13, [#allocation7], %s296_s24, %s296_s24, %s297_s25  }
  0x14   :  { %s222_s30 = scalar_lea.hbm %s385_s0, 128 }
  0x15   :  { %p223_p8 = scmp.ne.s32.totalorder %s385_s0, %s222_s30  ;;  %p226_p9 = scmp.lt.u32.totalorder %s222_s30, %s385_s0 }
  0x17   :  { %p228_p10 = pnand %p226_p9, %p223_p8 }
  0x19   :  { %231 = shalt.err (!%p228_p10)
}
  0x1a   :  { %s232_s8 = scalar_lea.vmem %s324_s15, 128  ;;  %p237_p12 = scmp.lt.s32.totalorder %s324_s15, %s324_s15 }
  0x1b   :  { %p233_p11 = scmp.ne.s32.totalorder %s324_s15, %s232_s8  ;;  %p238_p13 = scmp.lt.s32.totalorder %s232_s8, %s232_s8 }
  0x1d   :  { %p239_p0 = por %p238_p13, %p237_p12 }
  0x1f   :  { %p240_p1 = pnand %p239_p0, %p233_p11 }
  0x21   :  { %243 = shalt.err (!%p240_p1)
}
  0x22   :  { %22 = dma.hbm_to_vmem [thread:$0]  %s385_s0, 128, %s324_s15, [#allocation4], %s296_s24, %s296_s24, %s297_s25  }
  0x23   :  { %s298_s10 = smov [#allocation8]   ;;  %s244_s14 = scalar_lea.hbm %s387_s2, 16 }
  0x24   :  { %s41_s11 = sshll.u32 %s298_s10, 4  ;;  %p245_p2 = scmp.ne.s32.totalorder %s387_s2, %s244_s14  ;;  %s42_s11 = int_to_ptr.vmem [resolvable:$true] %s41_s11 }
  0x25   :  { %p248_p3 = scmp.lt.u32.totalorder %s244_s14, %s387_s2 }
  0x27   :  { %p250_p4 = pnand %p248_p3, %p245_p2 }
  0x29   :  { %253 = shalt.err (!%p250_p4)
}
  0x2a   :  { %s254_s20 = scalar_lea.vmem %s42_s11, 16  ;;  %s258_s0 = scalar_lea.vmem %s42_s11, 32 }
  0x2b   :  { %p255_p5 = scmp.ne.s32.totalorder %s42_s11, %s254_s20  ;;  %p259_p6 = scmp.lt.s32.totalorder %s42_s11, %s42_s11 }
  0x2c   :  { %p260_p7 = scmp.lt.s32.totalorder %s258_s0, %s254_s20 }
  0x2e   :  { %p261_p8 = por %p260_p7, %p259_p6 }
  0x30   :  { %p262_p9 = pnand %p261_p8, %p255_p5 }
  0x32   :  { %265 = shalt.err (!%p262_p9)
}
  0x33   :  { %44 = dma.hbm_to_vmem [thread:$0]  %s387_s2, 16, %s42_s11, [#allocation7]  }
  0x34   :  { %288 = dma.done.wait [#allocation4], 128  }
  0x35   :  { %289 = vsyncadd [#allocation4], 4294967168 }
  0x36   :  { %290 = dma.done.wait [#allocation7], 272  }
  0x37   :  { %291 = vsyncadd [#allocation7], 4294967024  ;;  %vm59_vm0 = vcmask 523264   ;;  %v299_v0 = vmov 0.0   ;;  %vm300_vm1 = vmmov 0   ;;  %v197_v1 = vld [vmem:[#allocation6] sm:$0xff]  }
  0x38   :  { %60 = vst.msk [vmem:[#allocation2] sm:$0xff] %vm59_vm0, %v299_v0  ;;  %61 = vst.msk [vmem:[#allocation2 + $0x8] sm:$0xff] %vm59_vm0, %v299_v0  ;;  %179 = vmatprep.subr.bf16.mxu0 %v299_v0  ;;  %183 = vmatprep.mubr.msk.bf16.mxu0 %vm300_vm1, %v299_v0  ;;  %v198_v2 = vld [vmem:[#allocation6 + $0x8] sm:$0xff]   ;;  %v199_v3 = vld [vmem:[#allocation3] sm:$0xff]   ;;  %vm87_vm2 = vcmask 261120   ;;  %s301_s2 = smov [#allocation9]  }
  0x39   :  { %180 = vmatpush3.bf16.msra.mxu0 %v197_v1  ;;  %v175_v12 = vld [vmem:[#allocation8] ss:$0 sm:$0xff]  ;;  %s158_s22 = sshll.u32 %s301_s2, 4  ;;  %s159_s22 = int_to_ptr.vmem [resolvable:$true] %s158_s22 }
  0x3a   :  { %181 = vmatprep.subr.bf16.mxu0 %v299_v0  ;;  %s266_s23 = scalar_lea.vmem %s159_s22, 256  ;;  %p271_p11 = scmp.lt.s32.totalorder %s159_s22, %s159_s22 }
  0x3b   :  { %p267_p10 = scmp.ne.s32.totalorder %s159_s22, %s266_s23  ;;  %p272_p12 = scmp.lt.s32.totalorder %s266_s23, %s266_s23 }
  0x3d   :  { %182 = vmatpush3.bf16.msra.mxu0 %v198_v2  ;;  %p273_p13 = por %p272_p12, %p271_p11 }
  0x3f   :  { %v62_v4 = vld [vmem:[#allocation2] sm:$0xff]  ;;  %v63_v6 = vld [vmem:[#allocation2 + $0x8] sm:$0xff]  ;;  %p274_p0 = pnand %p273_p13, %p267_p10 }
  0x40   :  { %184 = vmatmul.mubr.msk.bf16.vlgmr.msra.gmra.mrb[0].mxu0 %vm87_vm2, %v199_v3 }
 0x113   :  { %v125_v5 = vpop.f32.mrb[0].mxu0 }
 0x114   :  { %v132_v7 = vadd.f32 %v125_v5, %v62_v4  ;;  %v185_v8 = vpop.f32.mrb[1].mxu0 }
 0x115   :  { %v128_v9 = vpop.f32.mrb[2].mxu0 }
 0x116   :  { %135 = vst.msk [vmem:[#allocation2] sm:$0xff] %vm59_vm0, %v132_v7  ;;  %v133_v10 = vadd.f32 %v128_v9, %v63_v6  ;;  %v186_v11 = vpop.f32.mrb[3].mxu0 }
 0x118   :  { %136 = vst.msk [vmem:[#allocation2 + $0x8] sm:$0xff] %vm59_vm0, %v133_v10 }
 0x11d   :  { %v140_v13 = vld [vmem:[#allocation2] sm:$0xff] }
 0x11e   :  { %v149_v14 = vadd.f32 %v175_v12, %v140_v13 }
 0x11f   :  { %v141_v15 = vld [vmem:[#allocation2 + $0x8] sm:$0xff] }
 0x120   :  { %v150_v16 = vadd.f32 %v175_v12, %v141_v15  ;;  %151 = vst.msk [vmem:[#allocation9] sm:$0xff] %vm59_vm0, %v149_v14 }
 0x122   :  { %152 = vst.msk [vmem:[#allocation9 + $0x8] sm:$0xff] %vm59_vm0, %v150_v16 }
 0x123   :  { %277 = shalt.err (!%p274_p0)
}
 0x124   :  { %s278_s26 = scalar_lea.hbm %s388_s3, 256 }
 0x125   :  { %p279_p1 = scmp.ne.s32.totalorder %s388_s3, %s278_s26  ;;  %p282_p2 = scmp.lt.u32.totalorder %s278_s26, %s388_s3 }
 0x127   :  { %p284_p3 = pnand %p282_p2, %p279_p1 }
 0x129   :  { %287 = shalt.err (!%p284_p3)
}
 0x12a   :  { %s302_s4 = smov 128   ;;  %s303_s5 = smov 8  }
 0x12b   :  { %164 = dma.vmem_to_hbm [thread:$0]  %s159_s22, 256, %s388_s3, [#allocation5], %s302_s4, %s302_s4, %s303_s5  }
 0x12c   :  { %292 = dma.done.wait [#allocation5], 256  }
 0x12d   :  { %293 = vsyncadd [#allocation5], 4294967040 }
 0x12e   :  { %168 = vsyncpa [#allocation4], 1 }
 0x12f   :  { %169 = vsyncpa [#allocation7], 1 }
 0x130   :  { %170 = vsyncpa [#allocation5], 1 }

</bundles_post_ra>
